<compile_context>
chip_gen: v5e
topology: v5e:2x2
jax: 0.10.0
libtpu: 0.0.40
codegen_flags: <defaults>
</compile_context>

<pallas_src>
import jax
import jax.numpy as jnp
from jax.experimental import pallas as pl
from jax.experimental.pallas import tpu as pltpu

_LANES = 128                    # vreg lane width
_MAX_TM = 1024                  # cap on the flattened-spatial tile (fits VMEM easily at Cout<=32)
_VMEM_LIMIT = 32 * 1024 * 1024  # safe on v5e/v6e (128 MiB) and v7x (64 MiB)


def _round_up(x, m):
    return (x + m - 1) // m * m


# ---------------------------------------------------------------------------
# Pallas kernels
# ---------------------------------------------------------------------------

def _conv_taps_kernel(x_ref, w_ref, b_ref, o_ref, acc_ref):
    """One conv tap: acc += W_t @ X_t (channel-first, lane-dense output).

    Grid = (m_tiles, taps); the tap axis is the inner reduction axis.
      x_ref: (Cin_pad, tm) bf16     w_ref: (Cout, Cin_pad) bf16 (BN scale folded)
      b_ref: (Cout, 1) f32          o_ref: (Cout, tm) f32
      acc_ref: (Cout, tm) f32 VMEM scratch
    """
    t = pl.program_id(1)

    @pl.when(t == 0)
    def _():
        acc_ref[...] = jnp.zeros(acc_ref.shape, acc_ref.dtype)

    acc_ref[...] += jnp.dot(w_ref[...], x_ref[...],
                            preferred_element_type=jnp.float32)

    @pl.when(t == pl.num_programs(1) - 1)
    def _():
        y = acc_ref[...] + b_ref[...]                    # folded-BN bias
        o_ref[...] = jnp.maximum(y, 0.0).astype(o_ref.dtype)


def _max_taps_kernel(x_ref, o_ref, acc_ref):
    """Running max over the tap grid axis (3x3 stride-2 max pool)."""
    t = pl.program_id(1)

    @pl.when(t == 0)
    def _():
        acc_ref[...] = jnp.full(acc_ref.shape, -jnp.inf, acc_ref.dtype)

    acc_ref[...] = jnp.maximum(acc_ref[...], x_ref[...])

    @pl.when(t == pl.num_programs(1) - 1)
    def _():
        o_ref[...] = acc_ref[...].astype(o_ref.dtype)


# ---------------------------------------------------------------------------
# Wrappers (layout plumbing; hot-path compute is inside the kernels)
# ---------------------------------------------------------------------------

def _build_taps(act, k, s, p, pad_value, c_pad):
    """act (C, N, H, W) -> taps (k*k, c_pad, M); tap order is kh-major, then kw."""
    C, N, H, W = act.shape
    Ho = (H + 2 * p - k) // s + 1
    Wo = (W + 2 * p - k) // s + 1
    M = N * Ho * Wo
    ap = jnp.pad(act, ((0, c_pad - C), (0, 0), (p, p), (p, p)),
                 constant_values=pad_value)
    taps = jnp.stack(
        [ap[:, :, i:i + s * Ho:s, j:j + s * Wo:s].reshape(c_pad, M)
         for i in range(k) for j in range(k)], axis=0)
    return taps, (N, Ho, Wo, M)


def conv_bn_relu(act, w_taps, bias, k, s, p):
    """ConvModule forward, channel-first.

    act: (Cin, N, H, W) f32; w_taps: (k*k, Cout, Cin_pad) bf16 (BN scale folded);
    bias: (Cout, 1) f32.  Returns (Cout, N, Ho, Wo) f32.
    """
    taps_n, cout, cin_pad = w_taps.shape
    taps, (N, Ho, Wo, M) = _build_taps(act, k, s, p, 0.0, cin_pad)
    tm = min(_MAX_TM, _round_up(M, _LANES))
    Mp = _round_up(M, tm)
    taps = jnp.pad(taps, ((0, 0), (0, 0), (0, Mp - M))).astype(jnp.bfloat16)
    # TODO(synk): the tap tensor still materializes ~k*k x the input in HBM; next
    # step is in-kernel halo DMA (memory_space=pl.ANY + pltpu.make_async_copy) so
    # each input row is read once per conv.

    out = pl.pallas_call(
        _conv_taps_kernel,
        out_shape=jax.ShapeDtypeStruct((cout, Mp), jnp.float32),
        grid=(Mp // tm, taps_n),
        in_specs=[
            pl.BlockSpec((None, cin_pad, tm), lambda mi, t: (t, 0, mi)),
            pl.BlockSpec((None, cout, cin_pad), lambda mi, t: (t, 0, 0)),
            pl.BlockSpec((cout, 1), lambda mi, t: (0, 0)),
        ],
        out_specs=pl.BlockSpec((cout, tm), lambda mi, t: (0, mi)),
        scratch_shapes=[pltpu.VMEM((cout, tm), jnp.float32)],
        compiler_params=pltpu.CompilerParams(
            dimension_semantics=("parallel", "arbitrary"),
            vmem_limit_bytes=_VMEM_LIMIT),
    )(taps, w_taps, bias)
    return out[:, :M].reshape(cout, N, Ho, Wo)


def maxpool_3x3_s2_p1(act):
    """nn.MaxPool2d(3, 2, 1, ceil_mode=False) on a channel-first (C,N,H,W) array."""
    C = act.shape[0]
    k, s, p = 3, 2, 1
    taps, (N, Ho, Wo, M) = _build_taps(act, k, s, p, -jnp.inf, C)
    tm = min(_MAX_TM, _round_up(M, _LANES))
    Mp = _round_up(M, tm)
    taps = jnp.pad(taps, ((0, 0), (0, 0), (0, Mp - M)))

    out = pl.pallas_call(
        _max_taps_kernel,
        out_shape=jax.ShapeDtypeStruct((C, Mp), act.dtype),
        grid=(Mp // tm, k * k),
        in_specs=[pl.BlockSpec((None, C, tm), lambda mi, t: (t, 0, mi))],
        out_specs=pl.BlockSpec((C, tm), lambda mi, t: (0, mi)),
        scratch_shapes=[pltpu.VMEM((C, tm), jnp.float32)],
        compiler_params=pltpu.CompilerParams(
            dimension_semantics=("parallel", "arbitrary"),
            vmem_limit_bytes=_VMEM_LIMIT),
    )(taps)
    return out[:, :M].reshape(C, N, Ho, Wo)


# ---------------------------------------------------------------------------
# Deterministic parameter construction (synthetic weights; eval-mode BN fold)
# ---------------------------------------------------------------------------

def make_conv_params(key, cin, cout, k):
    kw_, kg, kb, km, kv = jax.random.split(key, 5)
    fan_in = cin * k * k
    w = jax.random.normal(kw_, (cout, cin, k, k), jnp.float32) / jnp.sqrt(fan_in)
    gamma = 1.0 + 0.1 * jax.random.normal(kg, (cout,), jnp.float32)
    beta = 0.1 * jax.random.normal(kb, (cout,), jnp.float32)
    rmean = 0.1 * jax.random.normal(km, (cout,), jnp.float32)
    rvar = jnp.abs(jax.random.normal(kv, (cout,), jnp.float32)) + 0.5
    eps = 1e-5
    scale = gamma / jnp.sqrt(rvar + eps)          # BN scale (folded into W below)
    bias = beta - rmean * scale                   # BN bias (kernel epilogue)

    cin_pad = _round_up(cin, 8)
    # (Cout,Cin,kh,kw) -> tap-stacked (kh*kw, Cout, Cin); fold BN scale into W;
    # zero-pad contraction dim Cin to a multiple of 8; bf16 operands (f32 accum).
    wt = jnp.transpose(w, (2, 3, 0, 1)).reshape(k * k, cout, cin)
    wt = wt * scale[None, :, None]
    wt = jnp.pad(wt, ((0, 0), (0, 0), (0, cin_pad - cin))).astype(jnp.bfloat16)
    return wt, bias.reshape(cout, 1).astype(jnp.float32)


def make_stem_params(key):
    k1, k2, k3, k4 = jax.random.split(key, 4)
    return {
        "conv_3x3": make_conv_params(k1, 3, 16, 3),   # 3->16, k3 s2 p1
        "left1":    make_conv_params(k2, 16, 8, 1),   # 16->8, k1 s1 p0
        "left2":    make_conv_params(k3, 8, 16, 3),   # 8->16, k3 s2 p1
        "fuse":     make_conv_params(k4, 32, 16, 3),  # 32->16, k3 s1 p1
    }


# ---------------------------------------------------------------------------
# StemBlock forward
# ---------------------------------------------------------------------------

def stem_block(x_nchw, params):
    x = jnp.transpose(x_nchw, (1, 0, 2, 3))               # NCHW -> CNHW

    w, b = params["conv_3x3"]
    x = conv_bn_relu(x, w, b, k=3, s=2, p=1)               # (16, N, H/2, W/2)

    w, b = params["left1"]
    xl = conv_bn_relu(x, w, b, k=1, s=1, p=0)              # (8,  N, H/2, W/2)
    w, b = params["left2"]
    xl = conv_bn_relu(xl, w, b, k=3, s=2, p=1)             # (16, N, H/4, W/4)

    xr = maxpool_3x3_s2_p1(x)                              # (16, N, H/4, W/4)

    y = jnp.concatenate([xl, xr], axis=0)                  # channel cat == torch dim=1

    w, b = params["fuse"]
    y = conv_bn_relu(y, w, b, k=3, s=1, p=1)               # (16, N, H/4, W/4)

    return jnp.transpose(y, (1, 0, 2, 3))                  # CNHW -> NCHW


# ---------------------------------------------------------------------------

if __name__ == "__main__":
    key = jax.random.PRNGKey(0)
    kx, kp = jax.random.split(key)
    x = jax.random.normal(kx, (2, 3, 16, 16), jnp.float32)   # NCHW, like PyTorch
    params = make_stem_params(kp)

    out = jax.jit(stem_block)(x, params)
    out = jax.block_until_ready(out)

    assert out.shape == (2, 16, 4, 4), out.shape
    assert bool(jnp.all(jnp.isfinite(out))) and bool(jnp.all(out >= 0.0))
    print("KERNEL_OK")
</pallas_src>

<mosaic_0001>
module attributes {stable_mosaic.version = 11 : i64} {
  func.func @_conv_taps_kernel(%arg0: i32, %arg1: i32, %arg2: memref<1x8x128xbf16, #tpu.memory_space<vmem>>, %arg3: memref<1x16x8xbf16, #tpu.memory_space<vmem>>, %arg4: memref<16x1xf32, #tpu.memory_space<vmem>>, %arg5: memref<16x128xf32, #tpu.memory_space<vmem>>, %arg6: memref<16x128xf32, #tpu.memory_space<vmem>>) attributes {dimension_semantics = [#tpu.dimension_semantics<parallel>, #tpu.dimension_semantics<arbitrary>], iteration_bounds = array<i64: 1, 9>, scalar_prefetch = 0 : i64, scratch_operands = 1 : i64, tpu.core_type = #tpu.core_type<tc>, window_params = [{transform_indices = @transform_0, window_bounds = array<i64: 1, 8, 128>}, {transform_indices = @transform_1, window_bounds = array<i64: 1, 16, 8>}, {pipeline_mode = #tpu.pipeline_mode<synchronous>, transform_indices = @transform_2, window_bounds = array<i64: 16, 1>}, {transform_indices = @transform_3, window_bounds = array<i64: 16, 128>}]} {
    %c0_i32 = arith.constant 0 : i32
    %0 = arith.cmpi eq, %arg1, %c0_i32 : i32
    %1 = arith.extui %0 : i1 to i32
    %c0_i32_0 = arith.constant 0 : i32
    %2 = arith.cmpi ne, %1, %c0_i32_0 : i32
    scf.if %2 {
      %cst_11 = arith.constant 0.000000e+00 : f32
      %14 = vector.broadcast %cst_11 : f32 to vector<16x128xf32>
      %c0_12 = arith.constant 0 : index
      %c0_13 = arith.constant 0 : index
      %15 = vector.load %arg6[%c0_12, %c0_13] : memref<16x128xf32, #tpu.memory_space<vmem>>, vector<16x128xf32>
      tpu.vector_store %arg6[%c0_12, %c0_13], %14 {strides = array<i32>} : memref<16x128xf32, #tpu.memory_space<vmem>>, vector<16x128xf32>,
    } else {
    }
    %c0 = arith.constant 0 : index
    %c0_1 = arith.constant 0 : index
    %3 = vector.load %arg6[%c0, %c0_1] : memref<16x128xf32, #tpu.memory_space<vmem>>, vector<16x128xf32>
    %c0_2 = arith.constant 0 : index
    %c0_3 = arith.constant 0 : index
    %c0_4 = arith.constant 0 : index
    %4 = vector.load %arg3[%c0_2, %c0_3, %c0_4] : memref<1x16x8xbf16, #tpu.memory_space<vmem>>, vector<1x16x8xbf16>
    %5 = vector.shape_cast %4 : vector<1x16x8xbf16> to vector<16x8xbf16>
    %c0_5 = arith.constant 0 : index
    %c0_6 = arith.constant 0 : index
    %c0_7 = arith.constant 0 : index
    %6 = vector.load %arg2[%c0_5, %c0_6, %c0_7] : memref<1x8x128xbf16, #tpu.memory_space<vmem>>, vector<1x8x128xbf16>
    %7 = vector.shape_cast %6 : vector<1x8x128xbf16> to vector<8x128xbf16>
    %cst = arith.constant dense<0.000000e+00> : vector<16x128xf32>
    %8 = tpu.matmul %5, %7, %cst {dimension_numbers = #tpu.dot_dimension_numbers<[1], [0], [0], [1], [0, 0, 1, 1], [], []>} : vector<16x8xbf16>, vector<8x128xbf16>, vector<16x128xf32> -> vector<16x128xf32>
    %9 = arith.addf %3, %8 : vector<16x128xf32>
    %c0_8 = arith.constant 0 : index
    %c0_9 = arith.constant 0 : index
    %10 = vector.load %arg6[%c0_8, %c0_9] : memref<16x128xf32, #tpu.memory_space<vmem>>, vector<16x128xf32>
    tpu.vector_store %arg6[%c0_8, %c0_9], %9 {strides = array<i32>} : memref<16x128xf32, #tpu.memory_space<vmem>>, vector<16x128xf32>,
    %c8_i32 = arith.constant 8 : i32
    %11 = arith.cmpi eq, %arg1, %c8_i32 : i32
    %12 = arith.extui %11 : i1 to i32
    %c0_i32_10 = arith.constant 0 : i32
    %13 = arith.cmpi ne, %12, %c0_i32_10 : i32
    scf.if %13 {
      %c0_11 = arith.constant 0 : index
      %c0_12 = arith.constant 0 : index
      %14 = vector.load %arg6[%c0_11, %c0_12] : memref<16x128xf32, #tpu.memory_space<vmem>>, vector<16x128xf32>
      %c0_13 = arith.constant 0 : index
      %c0_14 = arith.constant 0 : index
      %15 = vector.load %arg4[%c0_13, %c0_14] : memref<16x1xf32, #tpu.memory_space<vmem>>, vector<16x1xf32>
      %16 = vector.broadcast %15 : vector<16x1xf32> to vector<16x128xf32>
      %17 = arith.addf %14, %16 : vector<16x128xf32>
      %cst_15 = arith.constant 0.000000e+00 : f32
      %18 = vector.broadcast %cst_15 : f32 to vector<16x128xf32>
      %19 = arith.maximumf %17, %18 : vector<16x128xf32>
      %c0_16 = arith.constant 0 : index
      %c0_17 = arith.constant 0 : index
      %20 = vector.load %arg5[%c0_16, %c0_17] : memref<16x128xf32, #tpu.memory_space<vmem>>, vector<16x128xf32>
      tpu.vector_store %arg5[%c0_16, %c0_17], %19 {strides = array<i32>} : memref<16x128xf32, #tpu.memory_space<vmem>>, vector<16x128xf32>,
    } else {
    }
    return
  }
  func.func @transform_0(%arg0: i32, %arg1: i32) -> (i32, i32, i32) {
    %c0_i32 = arith.constant 0 : i32
    %c0_i32_0 = arith.constant 0 : i32
    return %arg1, %c0_i32, %arg0 : i32, i32, i32
  }
  func.func @transform_1(%arg0: i32, %arg1: i32) -> (i32, i32, i32) {
    %c0_i32 = arith.constant 0 : i32
    %c0_i32_0 = arith.constant 0 : i32
    %c0_i32_1 = arith.constant 0 : i32
    return %arg1, %c0_i32, %c0_i32_0 : i32, i32, i32
  }
  func.func @transform_2(%arg0: i32, %arg1: i32) -> (i32, i32) {
    %c0_i32 = arith.constant 0 : i32
    %c0_i32_0 = arith.constant 0 : i32
    %c0_i32_1 = arith.constant 0 : i32
    return %c0_i32, %c0_i32_0 : i32, i32
  }
  func.func @transform_3(%arg0: i32, %arg1: i32) -> (i32, i32) {
    %c0_i32 = arith.constant 0 : i32
    %c0_i32_0 = arith.constant 0 : i32
    return %c0_i32, %arg0 : i32, i32
  }
}

module attributes {stable_mosaic.version = 11 : i64} {
  func.func @_conv_taps_kernel(%arg0: i32, %arg1: i32, %arg2: memref<1x16x128xbf16, #tpu.memory_space<vmem>>, %arg3: memref<1x8x16xbf16, #tpu.memory_space<vmem>>, %arg4: memref<8x1xf32, #tpu.memory_space<vmem>>, %arg5: memref<8x128xf32, #tpu.memory_space<vmem>>, %arg6: memref<8x128xf32, #tpu.memory_space<vmem>>) attributes {dimension_semantics = [#tpu.dimension_semantics<parallel>, #tpu.dimension_semantics<arbitrary>], iteration_bounds = array<i64: 1, 1>, scalar_prefetch = 0 : i64, scratch_operands = 1 : i64, tpu.core_type = #tpu.core_type<tc>, window_params = [{transform_indices = @transform_0, window_bounds = array<i64: 1, 16, 128>}, {transform_indices = @transform_1, window_bounds = array<i64: 1, 8, 16>}, {pipeline_mode = #tpu.pipeline_mode<synchronous>, transform_indices = @transform_2, window_bounds = array<i64: 8, 1>}, {transform_indices = @transform_3, window_bounds = array<i64: 8, 128>}]} {
    %c0_i32 = arith.constant 0 : i32
    %0 = arith.cmpi eq, %arg1, %c0_i32 : i32
    %1 = arith.extui %0 : i1 to i32
    %c0_i32_0 = arith.constant 0 : i32
    %2 = arith.cmpi ne, %1, %c0_i32_0 : i32
    scf.if %2 {
      %cst_12 = arith.constant 0.000000e+00 : f32
      %14 = vector.broadcast %cst_12 : f32 to vector<8x128xf32>
      %c0_13 = arith.constant 0 : index
      %c0_14 = arith.constant 0 : index
      %15 = vector.load %arg6[%c0_13, %c0_14] : memref<8x128xf32, #tpu.memory_space<vmem>>, vector<8x128xf32>
      tpu.vector_store %arg6[%c0_13, %c0_14], %14 {strides = array<i32>} : memref<8x128xf32, #tpu.memory_space<vmem>>, vector<8x128xf32>,
    } else {
    }
    %c0 = arith.constant 0 : index
    %c0_1 = arith.constant 0 : index
    %3 = vector.load %arg6[%c0, %c0_1] : memref<8x128xf32, #tpu.memory_space<vmem>>, vector<8x128xf32>
    %c0_2 = arith.constant 0 : index
    %c0_3 = arith.constant 0 : index
    %c0_4 = arith.constant 0 : index
    %4 = vector.load %arg3[%c0_2, %c0_3, %c0_4] : memref<1x8x16xbf16, #tpu.memory_space<vmem>>, vector<1x8x16xbf16>
    %5 = vector.shape_cast %4 : vector<1x8x16xbf16> to vector<8x16xbf16>
    %c0_5 = arith.constant 0 : index
    %c0_6 = arith.constant 0 : index
    %c0_7 = arith.constant 0 : index
    %6 = vector.load %arg2[%c0_5, %c0_6, %c0_7] : memref<1x16x128xbf16, #tpu.memory_space<vmem>>, vector<1x16x128xbf16>
    %7 = vector.shape_cast %6 : vector<1x16x128xbf16> to vector<16x128xbf16>
    %cst = arith.constant dense<0.000000e+00> : vector<8x128xf32>
    %8 = tpu.matmul %5, %7, %cst {dimension_numbers = #tpu.dot_dimension_numbers<[1], [0], [0], [1], [0, 0, 1, 1], [], []>} : vector<8x16xbf16>, vector<16x128xbf16>, vector<8x128xf32> -> vector<8x128xf32>
    %9 = arith.addf %3, %8 : vector<8x128xf32>
    %c0_8 = arith.constant 0 : index
    %c0_9 = arith.constant 0 : index
    %10 = vector.load %arg6[%c0_8, %c0_9] : memref<8x128xf32, #tpu.memory_space<vmem>>, vector<8x128xf32>
    tpu.vector_store %arg6[%c0_8, %c0_9], %9 {strides = array<i32>} : memref<8x128xf32, #tpu.memory_space<vmem>>, vector<8x128xf32>,
    %c0_i32_10 = arith.constant 0 : i32
    %11 = arith.cmpi eq, %arg1, %c0_i32_10 : i32
    %12 = arith.extui %11 : i1 to i32
    %c0_i32_11 = arith.constant 0 : i32
    %13 = arith.cmpi ne, %12, %c0_i32_11 : i32
    scf.if %13 {
      %c0_12 = arith.constant 0 : index
      %c0_13 = arith.constant 0 : index
      %14 = vector.load %arg6[%c0_12, %c0_13] : memref<8x128xf32, #tpu.memory_space<vmem>>, vector<8x128xf32>
      %c0_14 = arith.constant 0 : index
      %c0_15 = arith.constant 0 : index
      %15 = vector.load %arg4[%c0_14, %c0_15] : memref<8x1xf32, #tpu.memory_space<vmem>>, vector<8x1xf32>
      %16 = vector.broadcast %15 : vector<8x1xf32> to vector<8x128xf32>
      %17 = arith.addf %14, %16 : vector<8x128xf32>
      %cst_16 = arith.constant 0.000000e+00 : f32
      %18 = vector.broadcast %cst_16 : f32 to vector<8x128xf32>
      %19 = arith.maximumf %17, %18 : vector<8x128xf32>
      %c0_17 = arith.constant 0 : index
      %c0_18 = arith.constant 0 : index
      %20 = vector.load %arg5[%c0_17, %c0_18] : memref<8x128xf32, #tpu.memory_space<vmem>>, vector<8x128xf32>
      tpu.vector_store %arg5[%c0_17, %c0_18], %19 {strides = array<i32>} : memref<8x128xf32, #tpu.memory_space<vmem>>, vector<8x128xf32>,
    } else {
    }
    return
  }
  func.func @transform_0(%arg0: i32, %arg1: i32) -> (i32, i32, i32) {
    %c0_i32 = arith.constant 0 : i32
    %c0_i32_0 = arith.constant 0 : i32
    return %arg1, %c0_i32, %arg0 : i32, i32, i32
  }
  func.func @transform_1(%arg0: i32, %arg1: i32) -> (i32, i32, i32) {
    %c0_i32 = arith.constant 0 : i32
    %c0_i32_0 = arith.constant 0 : i32
    %c0_i32_1 = arith.constant 0 : i32
    return %arg1, %c0_i32, %c0_i32_0 : i32, i32, i32
  }
  func.func @transform_2(%arg0: i32, %arg1: i32) -> (i32, i32) {
    %c0_i32 = arith.constant 0 : i32
    %c0_i32_0 = arith.constant 0 : i32
    %c0_i32_1 = arith.constant 0 : i32
    return %c0_i32, %c0_i32_0 : i32, i32
  }
  func.func @transform_3(%arg0: i32, %arg1: i32) -> (i32, i32) {
    %c0_i32 = arith.constant 0 : i32
    %c0_i32_0 = arith.constant 0 : i32
    return %c0_i32, %arg0 : i32, i32
  }
}

module attributes {stable_mosaic.version = 11 : i64} {
  func.func @_max_taps_kernel(%arg0: i32, %arg1: i32, %arg2: memref<1x16x128xf32, #tpu.memory_space<vmem>>, %arg3: memref<16x128xf32, #tpu.memory_space<vmem>>, %arg4: memref<16x128xf32, #tpu.memory_space<vmem>>) attributes {dimension_semantics = [#tpu.dimension_semantics<parallel>, #tpu.dimension_semantics<arbitrary>], iteration_bounds = array<i64: 1, 9>, scalar_prefetch = 0 : i64, scratch_operands = 1 : i64, tpu.core_type = #tpu.core_type<tc>, window_params = [{transform_indices = @transform_0, window_bounds = array<i64: 1, 16, 128>}, {transform_indices = @transform_1, window_bounds = array<i64: 16, 128>}]} {
    %c0_i32 = arith.constant 0 : i32
    %0 = arith.cmpi eq, %arg1, %c0_i32 : i32
    %1 = arith.extui %0 : i1 to i32
    %c0_i32_0 = arith.constant 0 : i32
    %2 = arith.cmpi ne, %1, %c0_i32_0 : i32
    scf.if %2 {
      %cst = arith.constant 0xFF800000 : f32
      %11 = vector.broadcast %cst : f32 to vector<16x128xf32>
      %c0_8 = arith.constant 0 : index
      %c0_9 = arith.constant 0 : index
      %12 = vector.load %arg4[%c0_8, %c0_9] : memref<16x128xf32, #tpu.memory_space<vmem>>, vector<16x128xf32>
      tpu.vector_store %arg4[%c0_8, %c0_9], %11 {strides = array<i32>} : memref<16x128xf32, #tpu.memory_space<vmem>>, vector<16x128xf32>,
    } else {
    }
    %c0 = arith.constant 0 : index
    %c0_1 = arith.constant 0 : index
    %3 = vector.load %arg4[%c0, %c0_1] : memref<16x128xf32, #tpu.memory_space<vmem>>, vector<16x128xf32>
    %c0_2 = arith.constant 0 : index
    %c0_3 = arith.constant 0 : index
    %c0_4 = arith.constant 0 : index
    %4 = vector.load %arg2[%c0_2, %c0_3, %c0_4] : memref<1x16x128xf32, #tpu.memory_space<vmem>>, vector<1x16x128xf32>
    %5 = vector.shape_cast %4 : vector<1x16x128xf32> to vector<16x128xf32>
    %6 = arith.maximumf %3, %5 : vector<16x128xf32>
    %c0_5 = arith.constant 0 : index
    %c0_6 = arith.constant 0 : index
    %7 = vector.load %arg4[%c0_5, %c0_6] : memref<16x128xf32, #tpu.memory_space<vmem>>, vector<16x128xf32>
    tpu.vector_store %arg4[%c0_5, %c0_6], %6 {strides = array<i32>} : memref<16x128xf32, #tpu.memory_space<vmem>>, vector<16x128xf32>,
    %c8_i32 = arith.constant 8 : i32
    %8 = arith.cmpi eq, %arg1, %c8_i32 : i32
    %9 = arith.extui %8 : i1 to i32
    %c0_i32_7 = arith.constant 0 : i32
    %10 = arith.cmpi ne, %9, %c0_i32_7 : i32
    scf.if %10 {
      %c0_8 = arith.constant 0 : index
      %c0_9 = arith.constant 0 : index
      %11 = vector.load %arg4[%c0_8, %c0_9] : memref<16x128xf32, #tpu.memory_space<vmem>>, vector<16x128xf32>
      %c0_10 = arith.constant 0 : index
      %c0_11 = arith.constant 0 : index
      %12 = vector.load %arg3[%c0_10, %c0_11] : memref<16x128xf32, #tpu.memory_space<vmem>>, vector<16x128xf32>
      tpu.vector_store %arg3[%c0_10, %c0_11], %11 {strides = array<i32>} : memref<16x128xf32, #tpu.memory_space<vmem>>, vector<16x128xf32>,
    } else {
    }
    return
  }
  func.func @transform_0(%arg0: i32, %arg1: i32) -> (i32, i32, i32) {
    %c0_i32 = arith.constant 0 : i32
    %c0_i32_0 = arith.constant 0 : i32
    return %arg1, %c0_i32, %arg0 : i32, i32, i32
  }
  func.func @transform_1(%arg0: i32, %arg1: i32) -> (i32, i32) {
    %c0_i32 = arith.constant 0 : i32
    %c0_i32_0 = arith.constant 0 : i32
    return %c0_i32, %arg0 : i32, i32
  }
}

module attributes {stable_mosaic.version = 11 : i64} {
  func.func @_conv_taps_kernel(%arg0: i32, %arg1: i32, %arg2: memref<1x32x128xbf16, #tpu.memory_space<vmem>>, %arg3: memref<1x16x32xbf16, #tpu.memory_space<vmem>>, %arg4: memref<16x1xf32, #tpu.memory_space<vmem>>, %arg5: memref<16x128xf32, #tpu.memory_space<vmem>>, %arg6: memref<16x128xf32, #tpu.memory_space<vmem>>) attributes {dimension_semantics = [#tpu.dimension_semantics<parallel>, #tpu.dimension_semantics<arbitrary>], iteration_bounds = array<i64: 1, 9>, scalar_prefetch = 0 : i64, scratch_operands = 1 : i64, tpu.core_type = #tpu.core_type<tc>, window_params = [{transform_indices = @transform_0, window_bounds = array<i64: 1, 32, 128>}, {transform_indices = @transform_1, window_bounds = array<i64: 1, 16, 32>}, {pipeline_mode = #tpu.pipeline_mode<synchronous>, transform_indices = @transform_2, window_bounds = array<i64: 16, 1>}, {transform_indices = @transform_3, window_bounds = array<i64: 16, 128>}]} {
    %c0_i32 = arith.constant 0 : i32
    %0 = arith.cmpi eq, %arg1, %c0_i32 : i32
    %1 = arith.extui %0 : i1 to i32
    %c0_i32_0 = arith.constant 0 : i32
    %2 = arith.cmpi ne, %1, %c0_i32_0 : i32
    scf.if %2 {
      %cst_11 = arith.constant 0.000000e+00 : f32
      %14 = vector.broadcast %cst_11 : f32 to vector<16x128xf32>
      %c0_12 = arith.constant 0 : index
      %c0_13 = arith.constant 0 : index
      %15 = vector.load %arg6[%c0_12, %c0_13] : memref<16x128xf32, #tpu.memory_space<vmem>>, vector<16x128xf32>
      tpu.vector_store %arg6[%c0_12, %c0_13], %14 {strides = array<i32>} : memref<16x128xf32, #tpu.memory_space<vmem>>, vector<16x128xf32>,
    } else {
    }
    %c0 = arith.constant 0 : index
    %c0_1 = arith.constant 0 : index
    %3 = vector.load %arg6[%c0, %c0_1] : memref<16x128xf32, #tpu.memory_space<vmem>>, vector<16x128xf32>
    %c0_2 = arith.constant 0 : index
    %c0_3 = arith.constant 0 : index
    %c0_4 = arith.constant 0 : index
    %4 = vector.load %arg3[%c0_2, %c0_3, %c0_4] : memref<1x16x32xbf16, #tpu.memory_space<vmem>>, vector<1x16x32xbf16>
    %5 = vector.shape_cast %4 : vector<1x16x32xbf16> to vector<16x32xbf16>
    %c0_5 = arith.constant 0 : index
    %c0_6 = arith.constant 0 : index
    %c0_7 = arith.constant 0 : index
    %6 = vector.load %arg2[%c0_5, %c0_6, %c0_7] : memref<1x32x128xbf16, #tpu.memory_space<vmem>>, vector<1x32x128xbf16>
    %7 = vector.shape_cast %6 : vector<1x32x128xbf16> to vector<32x128xbf16>
    %cst = arith.constant dense<0.000000e+00> : vector<16x128xf32>
    %8 = tpu.matmul %5, %7, %cst {dimension_numbers = #tpu.dot_dimension_numbers<[1], [0], [0], [1], [0, 0, 1, 1], [], []>} : vector<16x32xbf16>, vector<32x128xbf16>, vector<16x128xf32> -> vector<16x128xf32>
    %9 = arith.addf %3, %8 : vector<16x128xf32>
    %c0_8 = arith.constant 0 : index
    %c0_9 = arith.constant 0 : index
    %10 = vector.load %arg6[%c0_8, %c0_9] : memref<16x128xf32, #tpu.memory_space<vmem>>, vector<16x128xf32>
    tpu.vector_store %arg6[%c0_8, %c0_9], %9 {strides = array<i32>} : memref<16x128xf32, #tpu.memory_space<vmem>>, vector<16x128xf32>,
    %c8_i32 = arith.constant 8 : i32
    %11 = arith.cmpi eq, %arg1, %c8_i32 : i32
    %12 = arith.extui %11 : i1 to i32
    %c0_i32_10 = arith.constant 0 : i32
    %13 = arith.cmpi ne, %12, %c0_i32_10 : i32
    scf.if %13 {
      %c0_11 = arith.constant 0 : index
      %c0_12 = arith.constant 0 : index
      %14 = vector.load %arg6[%c0_11, %c0_12] : memref<16x128xf32, #tpu.memory_space<vmem>>, vector<16x128xf32>
      %c0_13 = arith.constant 0 : index
      %c0_14 = arith.constant 0 : index
      %15 = vector.load %arg4[%c0_13, %c0_14] : memref<16x1xf32, #tpu.memory_space<vmem>>, vector<16x1xf32>
      %16 = vector.broadcast %15 : vector<16x1xf32> to vector<16x128xf32>
      %17 = arith.addf %14, %16 : vector<16x128xf32>
      %cst_15 = arith.constant 0.000000e+00 : f32
      %18 = vector.broadcast %cst_15 : f32 to vector<16x128xf32>
      %19 = arith.maximumf %17, %18 : vector<16x128xf32>
      %c0_16 = arith.constant 0 : index
      %c0_17 = arith.constant 0 : index
      %20 = vector.load %arg5[%c0_16, %c0_17] : memref<16x128xf32, #tpu.memory_space<vmem>>, vector<16x128xf32>
      tpu.vector_store %arg5[%c0_16, %c0_17], %19 {strides = array<i32>} : memref<16x128xf32, #tpu.memory_space<vmem>>, vector<16x128xf32>,
    } else {
    }
    return
  }
  func.func @transform_0(%arg0: i32, %arg1: i32) -> (i32, i32, i32) {
    %c0_i32 = arith.constant 0 : i32
    %c0_i32_0 = arith.constant 0 : i32
    return %arg1, %c0_i32, %arg0 : i32, i32, i32
  }
  func.func @transform_1(%arg0: i32, %arg1: i32) -> (i32, i32, i32) {
    %c0_i32 = arith.constant 0 : i32
    %c0_i32_0 = arith.constant 0 : i32
    %c0_i32_1 = arith.constant 0 : i32
    return %arg1, %c0_i32, %c0_i32_0 : i32, i32, i32
  }
  func.func @transform_2(%arg0: i32, %arg1: i32) -> (i32, i32) {
    %c0_i32 = arith.constant 0 : i32
    %c0_i32_0 = arith.constant 0 : i32
    %c0_i32_1 = arith.constant 0 : i32
    return %c0_i32, %c0_i32_0 : i32, i32
  }
  func.func @transform_3(%arg0: i32, %arg1: i32) -> (i32, i32) {
    %c0_i32 = arith.constant 0 : i32
    %c0_i32_0 = arith.constant 0 : i32
    return %c0_i32, %arg0 : i32, i32
  }
}

</mosaic_0001>

<bundles_post_ra>
// kernel: stem_block.5
= control target key start
LH: loop header
LB: loop body
LE: loop exit
PB: predicated region body
PF: predicated region fallthrough
CT: control target
= control target key end

     0   :  { %s442_s12 = smov 0   ;;  %s444_s13 = smov 0   ;;  %s493_s0 = inlined_call_operand.vmem [shape: bf16[9,8,128], index: 0, kind: input, shape index: {}]   ;;  %s494_s1 = inlined_call_operand.vmem [shape: bf16[9,16,8], index: 1, kind: input, shape index: {}]   ;;  %s495_s2 = inlined_call_operand.vmem [shape: f32[16,1], index: 2, kind: input, shape index: {}]   ;;  %s496_s3 = inlined_call_operand.vmem [shape: f32[16,128], index: 3, kind: output, shape index: {}]  }
   0x1   :  { %s446_s14 = smov 0  }
   0x2 LB: > { %s22_s15 = sadd.s32 1, %s414_s13  ;;  %p353_p0 = scmp.ge.s32.totalorder %s418_s14, 1  ;;  %s418_s14 = sphi %s446_s14, %s13_s14   ;;  %s414_s13 = sphi %s444_s13, %s498_s13   ;;  %s410_s12 = sphi %s442_s12, %s497_s12  }
   0x3   : > { %p23_p1 = scmp.ge.s32.totalorder %s22_s15, 9  ;;  %p163_p2 = scmp.lt.s32.totalorder %s418_s14, 10 }
   0x5   : > { %s500_s15 = smov (%p23_p1, %s22_s15), 0  ;;  %p164_p3 = pnand %p353_p0, %p163_p2 }
   0x6   : > { %p193_p4 = scmp.lt.s32.totalorder (!%p164_p3), %s410_s12, 8  ;;  %p357_p5 = scmp.ne.s32.totalorder (!%p164_p3), %s410_s12, 0 }
   0x7   : > { %167 = sbr.rel (%p164_p3) target bundleno = 293 (0x125), region = 32 }
   0xc   : > { %s194_s16 = scalar_select %p193_p4, %s410_s12, 8 }
   0xd   : > { %213 = sbr.rel (%p357_p5) target bundleno = 21 (0x15), region = 36 }
   0xe   : > { %s354_s17 = sshll.u32 %s194_s16, 2  ;;  %s367_s18 = sshll.u32 %s194_s16, 3 }
   0xf   : > { %s199_s21 = scalar_lea.vmem %s493_s0, %s354_s17  ;;  %s204_s24 = scalar_lea.vmem %s494_s1, %s367_s18 }
  0x12   : > { %v420_v0 = vmov 0.0  }
  0x13   : > { %214 = vst [vmem:[#allocation2] sm:$0xff] %v420_v0 }
  0x14   : > { %215 = vst [vmem:[#allocation2 + $0x8] sm:$0xff] %v420_v0 }
  0x15 PF: > { %v220_v1 = vld [vmem:[%s199_s21] sm:$0xf]  ;;  %vm230_vm0 = vcmask 1043456   ;;  %vm226_vm1 = vcmask 64512   ;;  %p363_p6 = scmp.ne.s32.totalorder %s410_s12, 8 }
  0x16   : > { %v232_v2 = vsel %vm230_vm0, %v220_v1, 0  ;;  %v368_v3 = vld [vmem:[%s204_s24] sm:$0xff] }
  0x17   : > { %241 = vmatpush.bf16.msra.mxu0 %v232_v2 }
  0x1a   : > { %362 = vmatmul.msk.bf16.vlgmr.msra.gmra.mxu0 %vm226_vm1, %v368_v3  ;;  %v216_v4 = vld [vmem:[#allocation2] sm:$0xff] }
  0x1b   : > { %v217_v7 = vld [vmem:[#allocation2 + $0x8] sm:$0xff] }
  0x97   : > { %v243_v5 = vpop.f32.mrf.mxu0 }
  0x98   : > { %v248_v6 = vadd.f32 %v243_v5, %v216_v4 }
  0x9a   : > { %250 = vst [vmem:[#allocation2] sm:$0xff] %v248_v6 }
  0x9e   : > { %255 = sbr.rel (%p363_p6) target bundleno = 293 (0x125), region = 40 }
  0x9f   : > { %v245_v8 = vpop.f32.mrf.mxu0 }
  0xa0   : > { %v249_v9 = vadd.f32 %v245_v8, %v217_v7 }
  0xa2   : > { %251 = vst [vmem:[#allocation2 + $0x8] sm:$0xff] %v249_v9 }
  0xa3   : > { %v258_v10 = vld [vmem:[%s495_s2] sm:$0xff]  ;;  %v421_v11 = vmov 0   ;;  %v259_v12 = vld [vmem:[%s495_s2 + $0x8] sm:$0xff] }
  0xa4   : > { %395 = vset.pattern.permute.xlu0 %v421_v11  ;;  %v256_v13 = vld [vmem:[#allocation2] sm:$0xff] }
  0xa5   : > { %262 = vperm.xlu0 %395, %v258_v10  }
  0xa9   : > { %v257_v17 = vld [vmem:[#allocation2 + $0x8] sm:$0xff] }
  0xad   : > { %267 = vperm.xlu0 %395, %v259_v12  }
 0x117   : > { %v263_v14 = vpop.permute.xlu0 %262 }
 0x118   : > { %v270_v15 = vadd.f32 %v263_v14, %v256_v13 }
 0x11a   : > { %v272_v16 = vmax.f32 %v270_v15, 0.0 }
 0x11c   : > { %274 = vst [vmem:[%s496_s3] sm:$0xff] %v272_v16 }
 0x11f   : > { %v268_v18 = vpop.permute.xlu0 %267 }
 0x120   : > { %v271_v19 = vadd.f32 %v268_v18, %v257_v17 }
 0x122   : > { %v273_v20 = vmax.f32 %v271_v19, 0.0 }
 0x124   : > { %275 = vst [vmem:[%s496_s3 + $0x8] sm:$0xff] %v273_v20 }
 0x125 PF: > { %s13_s14 = sadd.s32 1, %s418_s14   ;;  %s497_s12 = smov %s414_s13 }
 0x126   : > { %p10_p7 = scmp.ge.s32.totalorder %s13_s14, 11   ;;  %s498_s13 = smov %s500_s15 }
 0x128   :  { %12 = sbr.rel (!%p10_p7) target bundleno = 2 (0x2), region = 73 }

// kernel: stem_block.6
= control target key start
LH: loop header
LB: loop body
LE: loop exit
PB: predicated region body
PF: predicated region fallthrough
CT: control target
= control target key end

     0   :  { %v74_v1 = vmov 0   ;;  %vm30_vm0 = vcmask 130048   ;;  %s107_s0 = inlined_call_operand.vmem [shape: bf16[1,16,128], index: 0, kind: input, shape index: {}]   ;;  %s108_s1 = inlined_call_operand.vmem [shape: bf16[1,8,16], index: 1, kind: input, shape index: {}]   ;;  %s109_s2 = inlined_call_operand.vmem [shape: f32[8,1], index: 2, kind: input, shape index: {}]   ;;  %s110_s3 = inlined_call_operand.vmem [shape: f32[8,128], index: 3, kind: output, shape index: {}]  }
   0x1   :  { %v71_v0 = vld [vmem:[%s107_s0] sm:$0xff]  ;;  %73 = vset.pattern.permute.xlu0 %v74_v1 }
   0x2   :  { %v53_v2 = vld [vmem:[%s109_s2] sm:$0xff]  ;;  %41 = vmatpush.bf16.msra.mxu0 %v71_v0 }
   0x3   :  { %56 = vperm.xlu0 %73, %v53_v2   ;;  %v21_v3 = vld [vmem:[%s108_s1] sm:$0xf] }
   0x5   :  { %70 = vmatmul.msk.bf16.vlgmr.msra.gmra.mxu0 %vm30_vm0, %v21_v3 }
  0x75   :  { %v57_v4 = vpop.permute.xlu0 %56 }
  0x82   :  { %v43_v5 = vpop.f32.mrf.mxu0 }
  0x83   :  { %v59_v6 = vadd.f32 %v57_v4, %v43_v5 }
  0x85   :  { %v60_v7 = vmax.f32 %v59_v6, 0.0 }
  0x87   :  { %61 = vst [vmem:[%s110_s3] sm:$0xff] %v60_v7 }
  0x8a   :  { %v45_v8 = vpop.f32.mrf.mxu0 }

// kernel: stem_block.8
= control target key start
LH: loop header
LB: loop body
LE: loop exit
PB: predicated region body
PF: predicated region fallthrough
CT: control target
= control target key end

     0   :  { %s297_s6 = smov 0   ;;  %s299_s7 = smov 0   ;;  %s333_s0 = inlined_call_operand.vmem [shape: f32[9,16,128], index: 0, kind: input, shape index: {}]   ;;  %s334_s1 = inlined_call_operand.vmem [shape: f32[16,128], index: 1, kind: output, shape index: {}]  }
   0x1   :  { %s301_s8 = smov 0  }
   0x2 LB: > { %s20_s9 = sadd.s32 1, %s280_s7  ;;  %p228_p0 = scmp.ge.s32.totalorder %s284_s8, 1  ;;  %s284_s8 = sphi %s301_s8, %s11_s8   ;;  %s280_s7 = sphi %s299_s7, %s336_s7   ;;  %s276_s6 = sphi %s297_s6, %s335_s6  }
   0x3   : > { %p21_p1 = scmp.ge.s32.totalorder %s20_s9, 9  ;;  %p104_p2 = scmp.lt.s32.totalorder %s284_s8, 10 }
   0x5   : > { %s338_s9 = smov (%p21_p1, %s20_s9), 0  ;;  %p105_p3 = pnand %p228_p0, %p104_p2 }
   0x6   : > { %p126_p4 = scmp.lt.s32.totalorder (!%p105_p3), %s276_s6, 8  ;;  %p231_p5 = scmp.ne.s32.totalorder (!%p105_p3), %s276_s6, 0 }
   0x7   : > { %108 = sbr.rel (%p105_p3) target bundleno = 39 (0x27), region = 24 }
   0xc   : > { %s127_s10 = scalar_select %p126_p4, %s276_s6, 8 }
   0xd   : > { %141 = sbr.rel (%p231_p5) target bundleno = 21 (0x15), region = 28 }
   0xe   : > { %s236_s11 = sshll.u32 %s127_s10, 4 }
   0xf   : > { %s133_s14 = scalar_lea.vmem %s333_s0, %s236_s11 }
  0x12   : > { %v286_v0 = vmov -inf  }
  0x13   : > { %142 = vst [vmem:[#allocation2] sm:$0xff] %v286_v0 }
  0x14   : > { %143 = vst [vmem:[#allocation2 + $0x8] sm:$0xff] %v286_v0 }
  0x15 PF: > { %v146_v2 = vld [vmem:[%s133_s14] sm:$0xff]  ;;  %v147_v5 = vld [vmem:[%s133_s14 + $0x8] sm:$0xff]  ;;  %p232_p6 = scmp.ne.s32.totalorder %s276_s6, 8 }
  0x1a   : > { %v144_v1 = vld [vmem:[#allocation2] sm:$0xff]  ;;  %155 = sbr.rel (%p232_p6) target bundleno = 39 (0x27), region = 32 }
  0x1b   : > { %v145_v3 = vld [vmem:[#allocation2 + $0x8] sm:$0xff]  ;;  %v148_v4 = vmax.f32 %v144_v1, %v146_v2 }
  0x1c   : > { %v149_v6 = vmax.f32 %v145_v3, %v147_v5 }
  0x1d   : > { %150 = vst [vmem:[#allocation2] sm:$0xff] %v148_v4 }
  0x1e   : > { %151 = vst [vmem:[#allocation2 + $0x8] sm:$0xff] %v149_v6 }
  0x24   : > { %v156_v7 = vld [vmem:[#allocation2] sm:$0xff] }
  0x25   : > { %v157_v8 = vld [vmem:[#allocation2 + $0x8] sm:$0xff]  ;;  %158 = vst [vmem:[%s334_s1] sm:$0xff] %v156_v7 }
  0x26   : > { %159 = vst [vmem:[%s334_s1 + $0x8] sm:$0xff] %v157_v8 }
  0x27 PF: > { %s11_s8 = sadd.s32 1, %s284_s8   ;;  %s335_s6 = smov %s280_s7 }
  0x28   : > { %p8_p7 = scmp.ge.s32.totalorder %s11_s8, 11   ;;  %s336_s7 = smov %s338_s9 }
  0x2a   :  { %10 = sbr.rel (!%p8_p7) target bundleno = 2 (0x2), region = 62 }

// kernel: stem_block.9
= control target key start
LH: loop header
LB: loop body
LE: loop exit
PB: predicated region body
PF: predicated region fallthrough
CT: control target
= control target key end

     0   :  { %s471_s12 = smov 0   ;;  %s473_s13 = smov 0   ;;  %s522_s0 = inlined_call_operand.vmem [shape: bf16[9,32,128], index: 0, kind: input, shape index: {}]   ;;  %s523_s1 = inlined_call_operand.vmem [shape: bf16[9,16,32], index: 1, kind: input, shape index: {}]   ;;  %s524_s2 = inlined_call_operand.vmem [shape: f32[16,1], index: 2, kind: input, shape index: {}]   ;;  %s525_s3 = inlined_call_operand.vmem [shape: f32[16,128], index: 3, kind: output, shape index: {}]  }
   0x1   :  { %s475_s14 = smov 0  }
   0x2 LB: > { %s22_s15 = sadd.s32 1, %s443_s13  ;;  %p370_p0 = scmp.ge.s32.totalorder %s447_s14, 1  ;;  %s447_s14 = sphi %s475_s14, %s13_s14   ;;  %s443_s13 = sphi %s473_s13, %s527_s13   ;;  %s439_s12 = sphi %s471_s12, %s526_s12  }
   0x3   : > { %p23_p1 = scmp.ge.s32.totalorder %s22_s15, 9  ;;  %p164_p2 = scmp.lt.s32.totalorder %s447_s14, 10 }
   0x5   : > { %s529_s15 = smov (%p23_p1, %s22_s15), 0  ;;  %p165_p3 = pnand %p370_p0, %p164_p2 }
   0x6   : > { %p195_p4 = scmp.lt.s32.totalorder (!%p165_p3), %s439_s12, 8  ;;  %p375_p5 = scmp.ne.s32.totalorder (!%p165_p3), %s439_s12, 0 }
   0x7   : > { %168 = sbr.rel (%p165_p3) target bundleno = 296 (0x128), region = 32 }
   0xc   : > { %s196_s16 = scalar_select %p195_p4, %s439_s12, 8 }
   0xd   : > { %216 = sbr.rel (%p375_p5) target bundleno = 21 (0x15), region = 36 }
   0xe   : > { %s393_s17 = sshll.u32 %s196_s16, 4  ;;  %s394_s18 = sshll.u32 %s196_s16, 3 }
   0xf   : > { %s202_s21 = scalar_lea.vmem %s522_s0, %s393_s17  ;;  %s207_s24 = scalar_lea.vmem %s523_s1, %s394_s18 }
  0x12   : > { %v449_v0 = vmov 0.0  }
  0x13   : > { %217 = vst [vmem:[#allocation2] sm:$0xff] %v449_v0 }
  0x14   : > { %218 = vst [vmem:[#allocation2 + $0x8] sm:$0xff] %v449_v0 }
  0x15 PF: > { %v397_v1 = vld [vmem:[%s202_s21 + $0x8] sm:$0xff]  ;;  %v396_v2 = vld [vmem:[%s202_s21] sm:$0xff]  ;;  %vm244_vm0 = vcmask 261120   ;;  %p389_p6 = scmp.ne.s32.totalorder %s439_s12, 8 }
  0x16   : > { %254 = vmatpush.bf16.msra.mxu0 %v397_v1  ;;  %v395_v3 = vld [vmem:[%s207_s24] sm:$0xff] }
  0x1a   : > { %255 = vmatpush.bf16.msra.mxu0 %v396_v2  ;;  %v219_v4 = vld [vmem:[#allocation2] sm:$0xff] }
  0x1b   : > { %v220_v7 = vld [vmem:[#allocation2 + $0x8] sm:$0xff] }
  0x1d   : > { %388 = vmatmul.msk.bf16.vlgmr.msra.gmra.mxu0 %vm244_vm0, %v395_v3 }
  0x9a   : > { %v257_v5 = vpop.f32.mrf.mxu0 }
  0x9b   : > { %v262_v6 = vadd.f32 %v257_v5, %v219_v4 }
  0x9d   : > { %264 = vst [vmem:[#allocation2] sm:$0xff] %v262_v6 }
  0xa1   : > { %269 = sbr.rel (%p389_p6) target bundleno = 296 (0x128), region = 40 }
  0xa2   : > { %v259_v8 = vpop.f32.mrf.mxu0 }
  0xa3   : > { %v263_v9 = vadd.f32 %v259_v8, %v220_v7 }
  0xa5   : > { %265 = vst [vmem:[#allocation2 + $0x8] sm:$0xff] %v263_v9 }
  0xa6   : > { %v272_v10 = vld [vmem:[%s524_s2] sm:$0xff]  ;;  %v450_v11 = vmov 0   ;;  %v273_v12 = vld [vmem:[%s524_s2 + $0x8] sm:$0xff] }
  0xa7   : > { %424 = vset.pattern.permute.xlu0 %v450_v11  ;;  %v270_v13 = vld [vmem:[#allocation2] sm:$0xff] }
  0xa8   : > { %276 = vperm.xlu0 %424, %v272_v10  }
  0xac   : > { %v271_v17 = vld [vmem:[#allocation2 + $0x8] sm:$0xff] }
  0xb0   : > { %281 = vperm.xlu0 %424, %v273_v12  }
 0x11a   : > { %v277_v14 = vpop.permute.xlu0 %276 }
 0x11b   : > { %v284_v15 = vadd.f32 %v277_v14, %v270_v13 }
 0x11d   : > { %v286_v16 = vmax.f32 %v284_v15, 0.0 }
 0x11f   : > { %288 = vst [vmem:[%s525_s3] sm:$0xff] %v286_v16 }
 0x122   : > { %v282_v18 = vpop.permute.xlu0 %281 }
 0x123   : > { %v285_v19 = vadd.f32 %v282_v18, %v271_v17 }
 0x125   : > { %v287_v20 = vmax.f32 %v285_v19, 0.0 }
 0x127   : > { %289 = vst [vmem:[%s525_s3 + $0x8] sm:$0xff] %v287_v20 }
 0x128 PF: > { %s13_s14 = sadd.s32 1, %s447_s14   ;;  %s526_s12 = smov %s443_s13 }
 0x129   : > { %p10_p7 = scmp.ge.s32.totalorder %s13_s14, 11   ;;  %s527_s13 = smov %s529_s15 }
 0x12b   :  { %12 = sbr.rel (!%p10_p7) target bundleno = 2 (0x2), region = 73 }

</bundles_post_ra>
